<compile_context>
chip_gen: v7x
topology: tpu7x:2x2x1
jax: 0.10.0
libtpu: 0.0.40
codegen_flags: <defaults>
</compile_context>

<pallas_src>
import functools
import math

import numpy as np
import jax
import jax.numpy as jnp
from jax.experimental import pallas as pl
from jax.experimental.pallas import tpu as pltpu

# ----------------------------- configuration (small, consistent with __init__) ---------------
NUM_GRAPHS = 2                      # data.num_graphs
NUM_NODES = 3                       # len(likelihoods_x)
NODE_DIM_LIST = [2, 1, 3]           # heterogeneous per-node x dims
NODE_DIM_MAX = max(NODE_DIM_LIST)   # 3
X0_SIZE = NUM_NODES * NODE_DIM_MAX  # 9
X_COMPACT = sum(NODE_DIM_LIST)      # 6  (== x_graph width)
H_ENC = [16, 16]                    # h_dim_list_enc
H_DEC = [16, 16]                    # h_dim_list_dec
Z_DIM = 4                           # z_dim  (likelihood_z params_size = 2 * z_dim)
DIM_INPUT_ENC = H_ENC[0]
_LOG_2PI = math.log(2.0 * math.pi)

EMB_OUT = NUM_NODES * DIM_INPUT_ENC     # 48
ENC0_OUT = NUM_NODES * H_ENC[1]         # 48
ZNN = NUM_NODES * Z_DIM                 # 12
DEC0_OUT = NUM_NODES * H_DEC[0]         # 48
XC = X_COMPACT                          # 6

# valid (unpadded) column indices inside the flattened [x0_size] per-graph x vector
MASK_IDX = np.concatenate(
    [i * NODE_DIM_MAX + np.arange(d) for i, d in enumerate(NODE_DIM_LIST)]
)

# ----------------------------- weight-slab layout (static, 8-row-aligned offsets) -------------
SLAB_COLS = 128
OFF_SEL_X = 0      # [9, 6]    x0 -> x_graph compaction (likelihood target only)
OFF_W_EMB = 16     # [9, 48]   per-node embedding block-diag, MASK_IDX gather folded in
OFF_W_ENC0 = 32    # [48, 48]  encoder GNN layer 0 (adjacency folded)
OFF_W_MU_Z = 80    # [48, 12]  encoder GNN layer 1 + mu selection folded
OFF_W_LV_Z = 128   # [48, 12]  encoder GNN layer 1 + logvar selection folded
OFF_W_DEC0 = 176   # [12, 48]  decoder GNN layer 0 (adjacency folded)
OFF_W_MU_X = 192   # [48, 6]   decoder GNN layer 1 @ head @ mu selection folded
OFF_W_LV_X = 240   # [48, 6]   decoder GNN layer 1 @ head @ logvar selection folded
ROW_B_EMB = 288    # [48]
ROW_B_ENC0 = 289   # [48]
ROW_B_MU_Z = 290   # [12]
ROW_B_LV_Z = 291   # [12]
ROW_B_DEC0 = 292   # [48]
ROW_B_MU_X = 293   # [6]
ROW_B_LV_X = 294   # [6]
SLAB_ROWS = 296


# ----------------------------- fused Pallas kernel --------------------------------------------
def _hvaca_fused_kernel(scal_ref, x_ref, eps_ref, slab_ref, out_ref):
    """Entire HVACA ELBO forward. scal_ref: SMEM [beta, 1/num_graphs]; x/eps/slab in VMEM."""
    f32 = jnp.float32
    beta = scal_ref[0]
    inv_g = scal_ref[1]

    x0 = x_ref[...]                                               # [G, 9]
    eps = eps_ref[...]                                            # [G, 12]

    def w(off, rows, cols):                                       # static slab views
        return slab_ref[off:off + rows, 0:cols]

    def b(row, cols):
        return slab_ref[row:row + 1, 0:cols]

    # likelihood target x_graph (off the serial encoder/decoder chain)
    x_c = jnp.dot(x0, w(OFF_SEL_X, X0_SIZE, XC), preferred_element_type=f32)        # [G, 6]

    # ---- encoder: embeddings (MASK_IDX folded) -> GNN0 -> (GNN1 + mu/logvar split folded) ----
    h = jnp.dot(x0, w(OFF_W_EMB, X0_SIZE, EMB_OUT), preferred_element_type=f32)
    h = jnp.maximum(h + b(ROW_B_EMB, EMB_OUT), 0.0)                                  # [G, 48]
    h = jnp.dot(h, w(OFF_W_ENC0, EMB_OUT, ENC0_OUT), preferred_element_type=f32)
    h = jnp.maximum(h + b(ROW_B_ENC0, ENC0_OUT), 0.0)                                # [G, 48]
    mu_z = jnp.dot(h, w(OFF_W_MU_Z, ENC0_OUT, ZNN), preferred_element_type=f32) + b(ROW_B_MU_Z, ZNN)
    lv_z = jnp.dot(h, w(OFF_W_LV_Z, ENC0_OUT, ZNN), preferred_element_type=f32) + b(ROW_B_LV_Z, ZNN)

    # ---- qz_x.rsample() ----
    z = mu_z + jnp.exp(0.5 * lv_z) * eps                                             # [G, 12]

    # ---- decoder: GNN0 + ReLU -> (GNN1 + likelihood heads + mu/logvar split folded) ----
    hd = jnp.dot(z, w(OFF_W_DEC0, ZNN, DEC0_OUT), preferred_element_type=f32)
    hd = jnp.maximum(hd + b(ROW_B_DEC0, DEC0_OUT), 0.0)                               # [G, 48]
    mu_x = jnp.dot(hd, w(OFF_W_MU_X, DEC0_OUT, XC), preferred_element_type=f32) + b(ROW_B_MU_X, XC)
    lv_x = jnp.dot(hd, w(OFF_W_LV_X, DEC0_OUT, XC), preferred_element_type=f32) + b(ROW_B_LV_X, XC)

    # ---- ELBO = E_g[ log p(x|z) ] - beta * E_g[ KL(q(z|x) || N(0,1)) ] ----
    lp = -0.5 * ((x_c - mu_x) ** 2 * jnp.exp(-lv_x) + lv_x + _LOG_2PI)
    log_prob_x = jnp.sum(lp) * inv_g
    kl = 0.5 * (mu_z * mu_z + jnp.exp(lv_z) - 1.0 - lv_z)
    kl_z = jnp.sum(kl) * inv_g
    elbo = log_prob_x - beta * kl_z

    # lane-dense (1,128) result row: [elbo, log_prob_x, kl_z, 0, ...]
    col = jax.lax.broadcasted_iota(jnp.int32, (1, SLAB_COLS), 1)
    row = jnp.where(col == 0, elbo, 0.0)
    row = jnp.where(col == 1, log_prob_x, row)
    row = jnp.where(col == 2, kl_z, row)
    out_ref[...] = row


# ----------------------------- host-side packing (NumPy, called ONCE) -------------------------
def _block_diag_np(mats):
    rows = sum(m.shape[0] for m in mats)
    cols = sum(m.shape[1] for m in mats)
    out = np.zeros((rows, cols), np.float64)
    r = c = 0
    for m in mats:
        out[r:r + m.shape[0], c:c + m.shape[1]] = np.asarray(m, np.float64)
        r += m.shape[0]
        c += m.shape[1]
    return out


def _selection_matrices_np():
    """0/1 matrices that de-interleave per-node [mu | logvar] blocks (graph-row layout)."""
    in_z, out_z = NUM_NODES * 2 * Z_DIM, NUM_NODES * Z_DIM
    s_mu_z = np.zeros((in_z, out_z), np.float64)
    s_lv_z = np.zeros((in_z, out_z), np.float64)
    for n in range(NUM_NODES):
        for k in range(Z_DIM):
            s_mu_z[n * 2 * Z_DIM + k, n * Z_DIM + k] = 1.0
            s_lv_z[n * 2 * Z_DIM + Z_DIM + k, n * Z_DIM + k] = 1.0
    in_x, out_x = 2 * X_COMPACT, X_COMPACT
    s_mu_x = np.zeros((in_x, out_x), np.float64)
    s_lv_x = np.zeros((in_x, out_x), np.float64)
    off_in = off_out = 0
    for d in NODE_DIM_LIST:
        for k in range(d):
            s_mu_x[off_in + k, off_out + k] = 1.0
            s_lv_x[off_in + d + k, off_out + k] = 1.0
        off_in += 2 * d
        off_out += d
    return s_mu_z, s_lv_z, s_mu_x, s_lv_x


def pack_weight_slab(params, A_single):
    """Fold everything call-invariant into one [SLAB_ROWS, 128] f32 VMEM slab.
    Pure NumPy; call once and reuse for every forward call."""
    nn_ = NUM_NODES
    f64 = np.float64
    A = np.asarray(A_single, f64)

    def agg(d_out):
        return np.kron(A.T, np.eye(d_out, dtype=f64))

    # encoder embeddings (block-diag) with the MASK_IDX gather folded in (zero rows at pads)
    w_emb_bd = _block_diag_np([params["embed"][i][0] for i in range(nn_)])
    w_emb9 = np.zeros((X0_SIZE, EMB_OUT), f64)
    w_emb9[MASK_IDX, :] = w_emb_bd
    b_emb = np.concatenate([np.asarray(params["embed"][i][1], f64) for i in range(nn_)])

    def fuse_gnn(layer):
        w_bd = np.asarray(layer[0], f64)          # [NN*din, NN*dout]
        b_stack = np.asarray(layer[1], f64)       # [NN, dout]
        d_out = w_bd.shape[1] // nn_
        return w_bd @ agg(d_out), b_stack.reshape(-1)

    w_enc0, b_enc0 = fuse_gnn(params["enc"][0])
    w_enc1, b_enc1 = fuse_gnn(params["enc"][1])
    w_dec0, b_dec0 = fuse_gnn(params["dec"][0])
    w_dec1, b_dec1 = fuse_gnn(params["dec"][1])
    w_head = np.asarray(params["head"][0], f64)
    b_head = np.asarray(params["head"][1], f64)

    s_mu_z, s_lv_z, s_mu_x, s_lv_x = _selection_matrices_np()

    # fold mu/logvar de-interleave into the last encoder layer
    w_mu_z, b_mu_z = w_enc1 @ s_mu_z, b_enc1 @ s_mu_z
    w_lv_z, b_lv_z = w_enc1 @ s_lv_z, b_enc1 @ s_lv_z
    # fold decoder layer 1 (activation-free) + likelihood heads + de-interleave into one linear
    w_dh = w_dec1 @ w_head
    b_dh = b_dec1 @ w_head + b_head
    w_mu_x, b_mu_x = w_dh @ s_mu_x, b_dh @ s_mu_x
    w_lv_x, b_lv_x = w_dh @ s_lv_x, b_dh @ s_lv_x

    # compaction matrix for the likelihood target x_graph
    sel_x = np.zeros((X0_SIZE, X_COMPACT), f64)
    sel_x[MASK_IDX, np.arange(X_COMPACT)] = 1.0

    slab = np.zeros((SLAB_ROWS, SLAB_COLS), np.float32)

    def put(off, m):
        m = np.asarray(m, np.float32)
        if m.ndim == 1:
            m = m.reshape(1, -1)
        slab[off:off + m.shape[0], :m.shape[1]] = m

    put(OFF_SEL_X, sel_x)
    put(OFF_W_EMB, w_emb9)
    put(OFF_W_ENC0, w_enc0)
    put(OFF_W_MU_Z, w_mu_z)
    put(OFF_W_LV_Z, w_lv_z)
    put(OFF_W_DEC0, w_dec0)
    put(OFF_W_MU_X, w_mu_x)
    put(OFF_W_LV_X, w_lv_x)
    put(ROW_B_EMB, b_emb)
    put(ROW_B_ENC0, b_enc0)
    put(ROW_B_MU_Z, b_mu_z)
    put(ROW_B_LV_Z, b_lv_z)
    put(ROW_B_DEC0, b_dec0)
    put(ROW_B_MU_X, b_mu_x)
    put(ROW_B_LV_X, b_lv_x)
    return jnp.asarray(slab)


# ----------------------------- Pallas wrapper (hot path) --------------------------------------
def hvaca_forward_elbo_pallas(slab, X, eps_z, beta):
    G = NUM_GRAPHS
    X0 = X.reshape(G, X0_SIZE)                               # [G, 9]
    eps_g = eps_z.reshape(G, NUM_NODES * Z_DIM)              # [G, 12] graph-row layout
    scalars = jnp.stack([jnp.asarray(beta, jnp.float32),
                         jnp.asarray(1.0 / G, jnp.float32)])

    flops = 2 * G * (X0_SIZE * XC + X0_SIZE * EMB_OUT + EMB_OUT * ENC0_OUT
                     + 2 * ENC0_OUT * ZNN + ZNN * DEC0_OUT + 2 * DEC0_OUT * XC)
    bytes_accessed = 4 * (SLAB_ROWS * SLAB_COLS + X0.size + eps_g.size + SLAB_COLS + 2)

    vmem = pl.BlockSpec(memory_space=pltpu.MemorySpace.VMEM)
    smem = pl.BlockSpec(memory_space=pltpu.MemorySpace.SMEM)
    out = pl.pallas_call(
        _hvaca_fused_kernel,
        out_shape=jax.ShapeDtypeStruct((1, SLAB_COLS), jnp.float32),
        in_specs=[smem, vmem, vmem, vmem],
        out_specs=vmem,
        cost_estimate=pl.CostEstimate(flops=flops, transcendentals=5 * G * ZNN,
                                      bytes_accessed=bytes_accessed),
    )(scalars, X0, eps_g, slab)
    return out[0, 0], out[0, 1], out[0, 2]


# ----------------------------- pure-JAX reference (original node-row formulation) -------------
def hvaca_forward_elbo_ref(params, X, A_batched, eps_z, beta):
    G = NUM_GRAPHS
    X0 = X.reshape(G, X0_SIZE)
    embeds = []
    for i in range(NUM_NODES):
        Wi, bi = params["embed"][i]
        xi = X0[:, i * NODE_DIM_MAX: i * NODE_DIM_MAX + NODE_DIM_LIST[i]]
        embeds.append(jnp.maximum(xi @ Wi + bi[None, :], 0.0))
    H = jnp.concatenate(embeds, axis=1).reshape(G * NUM_NODES, DIM_INPUT_ENC)

    def gnn_layer(Hin, layer, act):
        W_bd, b_stack = layer
        d_in = Hin.shape[1]
        d_out = W_bd.shape[1] // NUM_NODES
        Hg = Hin.reshape(G, NUM_NODES * d_in)
        msg = (Hg @ W_bd).reshape(G * NUM_NODES, d_out)
        out = A_batched @ msg + jnp.tile(b_stack, (G, 1))
        return jnp.maximum(out, 0.0) if act == "relu" else out

    H = gnn_layer(H, params["enc"][0], "relu")
    logits_z = gnn_layer(H, params["enc"][1], None)
    mu_z, logvar_z = jnp.split(logits_z, 2, axis=1)
    z = mu_z + jnp.exp(0.5 * logvar_z) * eps_z
    Hd = gnn_layer(z, params["dec"][0], "relu")
    Hd = gnn_layer(Hd, params["dec"][1], None)

    W_head, b_head = params["head"]
    logits_x = Hd.reshape(G, NUM_NODES * H_DEC[-1]) @ W_head + b_head[None, :]
    mu_parts, lv_parts, off = [], [], 0
    for di in NODE_DIM_LIST:
        mu_parts.append(logits_x[:, off:off + di])
        lv_parts.append(logits_x[:, off + di:off + 2 * di])
        off += 2 * di
    mu_x = jnp.concatenate(mu_parts, axis=1)
    logvar_x = jnp.concatenate(lv_parts, axis=1)

    x_graph = X0[:, MASK_IDX]
    lp = -0.5 * ((x_graph - mu_x) ** 2 * jnp.exp(-logvar_x) + logvar_x + _LOG_2PI)
    lpx = jnp.sum(lp) / G
    kl = 0.5 * (mu_z ** 2 + jnp.exp(logvar_z) - 1.0 - logvar_z)
    klz = jnp.sum(kl) / G
    return lpx - beta * klz, lpx, klz


# ----------------------------- parameter construction (deterministic) ------------------------
def _init_linear(key, d_in, d_out, scale=1.0):
    kw, kb = jax.random.split(key)
    W = (scale / np.sqrt(d_in)) * jax.random.normal(kw, (d_in, d_out), jnp.float32)
    b = 0.01 * jax.random.normal(kb, (d_out,), jnp.float32)
    return W, b


def build_params(key):
    keys = iter(jax.random.split(key, 32))
    params = {}
    # per-node encoder embeddings: Linear(node_dim_i -> dim_input_enc) + ReLU
    params["embed"] = [_init_linear(next(keys), NODE_DIM_LIST[i], DIM_INPUT_ENC)
                       for i in range(NUM_NODES)]
    # encoder GNN: c_list = h_dim_list_enc + [likelihood_z.params_size]  -> [16, 16, 8]
    enc_dims = H_ENC + [2 * Z_DIM]
    params["enc"] = []
    for l in range(len(enc_dims) - 1):
        Ws, bs = zip(*[_init_linear(next(keys), enc_dims[l], enc_dims[l + 1])
                       for _ in range(NUM_NODES)])
        params["enc"].append((jnp.asarray(_block_diag_np(list(Ws)), jnp.float32), jnp.stack(bs)))
    # decoder GNN: c_list = [z_dim] + h_dim_list_dec -> [4, 16, 16]
    dec_dims = [Z_DIM] + H_DEC
    params["dec"] = []
    for l in range(len(dec_dims) - 1):
        Ws, bs = zip(*[_init_linear(next(keys), dec_dims[l], dec_dims[l + 1])
                       for _ in range(NUM_NODES)])
        params["dec"].append((jnp.asarray(_block_diag_np(list(Ws)), jnp.float32), jnp.stack(bs)))
    # heterogeneous likelihood heads: Linear(h_dec_last -> 2 * node_dim_i) per node
    Ws, bs = zip(*[_init_linear(next(keys), H_DEC[-1], 2 * NODE_DIM_LIST[n])
                   for n in range(NUM_NODES)])
    params["head"] = (jnp.asarray(_block_diag_np(list(Ws)), jnp.float32), jnp.concatenate(bs))
    return params


# ----------------------------- main -----------------------------------------------------------
if __name__ == "__main__":
    key = jax.random.PRNGKey(0)
    kx, keps, kp = jax.random.split(key, 3)
    params = build_params(kp)

    # data.x : [num_graphs*num_nodes, node_dim_max], padded dims zeroed
    X = jax.random.normal(kx, (NUM_GRAPHS * NUM_NODES, NODE_DIM_MAX), jnp.float32)
    valid = np.zeros((NUM_NODES, NODE_DIM_MAX), np.float32)
    for i, d in enumerate(NODE_DIM_LIST):
        valid[i, :d] = 1.0
    X = X * jnp.asarray(np.tile(valid, (NUM_GRAPHS, 1)))

    # per-graph adjacency (chain DAG with self-loops); batched block-diag version for the ref
    A_single = np.array([[1, 0, 0],
                         [1, 1, 0],
                         [1, 1, 1]], np.float32)
    A_batched = jnp.asarray(np.kron(np.eye(NUM_GRAPHS, dtype=np.float32), A_single))

    eps_z = jax.random.normal(keps, (NUM_GRAPHS * NUM_NODES, Z_DIM), jnp.float32)

    # pack all call-invariant operands ONCE (NumPy, off the hot path)
    slab = pack_weight_slab(params, A_single)

    forward = jax.jit(hvaca_forward_elbo_pallas)
    beta = jnp.float32(1.0)                       # traced scalar -> no recompile on annealing
    elbo_v, lpx_v, kl_v = forward(slab, X, eps_z, beta)
    jax.block_until_ready(elbo_v)

    elbo_r, lpx_r, kl_r = hvaca_forward_elbo_ref(params, X, A_batched, eps_z, 1.0)
    np.testing.assert_allclose(np.asarray(elbo_v), np.asarray(elbo_r), rtol=2e-2, atol=2e-2)
    np.testing.assert_allclose(np.asarray(lpx_v), np.asarray(lpx_r), rtol=2e-2, atol=2e-2)
    np.testing.assert_allclose(np.asarray(kl_v), np.asarray(kl_r), rtol=2e-2, atol=2e-2)

    print("KERNEL_OK")
</pallas_src>

<mosaic_0001>
module attributes {stable_mosaic.version = 11 : i64} {
  func.func @_hvaca_fused_kernel(%arg0: memref<2xf32, #tpu.memory_space<smem>>, %arg1: memref<2x9xf32, #tpu.memory_space<vmem>>, %arg2: memref<2x12xf32, #tpu.memory_space<vmem>>, %arg3: memref<296x128xf32, #tpu.memory_space<vmem>>, %arg4: memref<1x128xf32, #tpu.memory_space<vmem>>) attributes {dimension_semantics = [], scalar_prefetch = 0 : i64, scratch_operands = 0 : i64, tpu.core_type = #tpu.core_type<tc>} {
    %c0 = arith.constant 0 : index
    %0 = memref.load %arg0[%c0] : memref<2xf32, #tpu.memory_space<smem>>
    %c1 = arith.constant 1 : index
    %1 = memref.load %arg0[%c1] : memref<2xf32, #tpu.memory_space<smem>>
    %c0_0 = arith.constant 0 : index
    %c0_1 = arith.constant 0 : index
    %2 = vector.load %arg1[%c0_0, %c0_1] : memref<2x9xf32, #tpu.memory_space<vmem>>, vector<2x9xf32>
    %c0_2 = arith.constant 0 : index
    %c0_3 = arith.constant 0 : index
    %3 = vector.load %arg2[%c0_2, %c0_3] : memref<2x12xf32, #tpu.memory_space<vmem>>, vector<2x12xf32>
    %c0_4 = arith.constant 0 : index
    %c0_5 = arith.constant 0 : index
    %4 = vector.load %arg3[%c0_4, %c0_5] : memref<296x128xf32, #tpu.memory_space<vmem>>, vector<9x6xf32>
    %cst = arith.constant dense<0.000000e+00> : vector<2x6xf32>
    %5 = tpu.matmul %2, %4, %cst {dimension_numbers = #tpu.dot_dimension_numbers<[1], [0], [0], [1], [0, 0, 1, 1], [], []>} : vector<2x9xf32>, vector<9x6xf32>, vector<2x6xf32> -> vector<2x6xf32>
    %c16 = arith.constant 16 : index
    %c0_6 = arith.constant 0 : index
    %6 = vector.load %arg3[%c16, %c0_6] : memref<296x128xf32, #tpu.memory_space<vmem>>, vector<9x48xf32>
    %cst_7 = arith.constant dense<0.000000e+00> : vector<2x48xf32>
    %7 = tpu.matmul %2, %6, %cst_7 {dimension_numbers = #tpu.dot_dimension_numbers<[1], [0], [0], [1], [0, 0, 1, 1], [], []>} : vector<2x9xf32>, vector<9x48xf32>, vector<2x48xf32> -> vector<2x48xf32>
    %c288 = arith.constant 288 : index
    %c0_8 = arith.constant 0 : index
    %8 = vector.load %arg3[%c288, %c0_8] : memref<296x128xf32, #tpu.memory_space<vmem>>, vector<1x48xf32>
    %9 = vector.broadcast %8 : vector<1x48xf32> to vector<2x48xf32>
    %10 = arith.addf %7, %9 : vector<2x48xf32>
    %cst_9 = arith.constant 0.000000e+00 : f32
    %11 = vector.broadcast %cst_9 : f32 to vector<2x48xf32>
    %12 = arith.maximumf %10, %11 : vector<2x48xf32>
    %c32 = arith.constant 32 : index
    %c0_10 = arith.constant 0 : index
    %13 = vector.load %arg3[%c32, %c0_10] : memref<296x128xf32, #tpu.memory_space<vmem>>, vector<48x48xf32>
    %cst_11 = arith.constant dense<0.000000e+00> : vector<2x48xf32>
    %14 = tpu.matmul %12, %13, %cst_11 {dimension_numbers = #tpu.dot_dimension_numbers<[1], [0], [0], [1], [0, 0, 1, 1], [], []>} : vector<2x48xf32>, vector<48x48xf32>, vector<2x48xf32> -> vector<2x48xf32>
    %c289 = arith.constant 289 : index
    %c0_12 = arith.constant 0 : index
    %15 = vector.load %arg3[%c289, %c0_12] : memref<296x128xf32, #tpu.memory_space<vmem>>, vector<1x48xf32>
    %16 = vector.broadcast %15 : vector<1x48xf32> to vector<2x48xf32>
    %17 = arith.addf %14, %16 : vector<2x48xf32>
    %cst_13 = arith.constant 0.000000e+00 : f32
    %18 = vector.broadcast %cst_13 : f32 to vector<2x48xf32>
    %19 = arith.maximumf %17, %18 : vector<2x48xf32>
    %c80 = arith.constant 80 : index
    %c0_14 = arith.constant 0 : index
    %20 = vector.load %arg3[%c80, %c0_14] : memref<296x128xf32, #tpu.memory_space<vmem>>, vector<48x12xf32>
    %cst_15 = arith.constant dense<0.000000e+00> : vector<2x12xf32>
    %21 = tpu.matmul %19, %20, %cst_15 {dimension_numbers = #tpu.dot_dimension_numbers<[1], [0], [0], [1], [0, 0, 1, 1], [], []>} : vector<2x48xf32>, vector<48x12xf32>, vector<2x12xf32> -> vector<2x12xf32>
    %c290 = arith.constant 290 : index
    %c0_16 = arith.constant 0 : index
    %22 = vector.load %arg3[%c290, %c0_16] : memref<296x128xf32, #tpu.memory_space<vmem>>, vector<1x12xf32>
    %23 = vector.broadcast %22 : vector<1x12xf32> to vector<2x12xf32>
    %24 = arith.addf %21, %23 : vector<2x12xf32>
    %c128 = arith.constant 128 : index
    %c0_17 = arith.constant 0 : index
    %25 = vector.load %arg3[%c128, %c0_17] : memref<296x128xf32, #tpu.memory_space<vmem>>, vector<48x12xf32>
    %cst_18 = arith.constant dense<0.000000e+00> : vector<2x12xf32>
    %26 = tpu.matmul %19, %25, %cst_18 {dimension_numbers = #tpu.dot_dimension_numbers<[1], [0], [0], [1], [0, 0, 1, 1], [], []>} : vector<2x48xf32>, vector<48x12xf32>, vector<2x12xf32> -> vector<2x12xf32>
    %c291 = arith.constant 291 : index
    %c0_19 = arith.constant 0 : index
    %27 = vector.load %arg3[%c291, %c0_19] : memref<296x128xf32, #tpu.memory_space<vmem>>, vector<1x12xf32>
    %28 = vector.broadcast %27 : vector<1x12xf32> to vector<2x12xf32>
    %29 = arith.addf %26, %28 : vector<2x12xf32>
    %cst_20 = arith.constant 5.000000e-01 : f32
    %30 = vector.broadcast %cst_20 : f32 to vector<2x12xf32>
    %31 = arith.mulf %30, %29 : vector<2x12xf32>
    %32 = math.exp %31 : vector<2x12xf32>
    %33 = arith.mulf %32, %3 : vector<2x12xf32>
    %34 = arith.addf %24, %33 : vector<2x12xf32>
    %c176 = arith.constant 176 : index
    %c0_21 = arith.constant 0 : index
    %35 = vector.load %arg3[%c176, %c0_21] : memref<296x128xf32, #tpu.memory_space<vmem>>, vector<12x48xf32>
    %cst_22 = arith.constant dense<0.000000e+00> : vector<2x48xf32>
    %36 = tpu.matmul %34, %35, %cst_22 {dimension_numbers = #tpu.dot_dimension_numbers<[1], [0], [0], [1], [0, 0, 1, 1], [], []>} : vector<2x12xf32>, vector<12x48xf32>, vector<2x48xf32> -> vector<2x48xf32>
    %c292 = arith.constant 292 : index
    %c0_23 = arith.constant 0 : index
    %37 = vector.load %arg3[%c292, %c0_23] : memref<296x128xf32, #tpu.memory_space<vmem>>, vector<1x48xf32>
    %38 = vector.broadcast %37 : vector<1x48xf32> to vector<2x48xf32>
    %39 = arith.addf %36, %38 : vector<2x48xf32>
    %cst_24 = arith.constant 0.000000e+00 : f32
    %40 = vector.broadcast %cst_24 : f32 to vector<2x48xf32>
    %41 = arith.maximumf %39, %40 : vector<2x48xf32>
    %c192 = arith.constant 192 : index
    %c0_25 = arith.constant 0 : index
    %42 = vector.load %arg3[%c192, %c0_25] : memref<296x128xf32, #tpu.memory_space<vmem>>, vector<48x6xf32>
    %cst_26 = arith.constant dense<0.000000e+00> : vector<2x6xf32>
    %43 = tpu.matmul %41, %42, %cst_26 {dimension_numbers = #tpu.dot_dimension_numbers<[1], [0], [0], [1], [0, 0, 1, 1], [], []>} : vector<2x48xf32>, vector<48x6xf32>, vector<2x6xf32> -> vector<2x6xf32>
    %c293 = arith.constant 293 : index
    %c0_27 = arith.constant 0 : index
    %44 = vector.load %arg3[%c293, %c0_27] : memref<296x128xf32, #tpu.memory_space<vmem>>, vector<1x6xf32>
    %45 = vector.broadcast %44 : vector<1x6xf32> to vector<2x6xf32>
    %46 = arith.addf %43, %45 : vector<2x6xf32>
    %c240 = arith.constant 240 : index
    %c0_28 = arith.constant 0 : index
    %47 = vector.load %arg3[%c240, %c0_28] : memref<296x128xf32, #tpu.memory_space<vmem>>, vector<48x6xf32>
    %cst_29 = arith.constant dense<0.000000e+00> : vector<2x6xf32>
    %48 = tpu.matmul %41, %47, %cst_29 {dimension_numbers = #tpu.dot_dimension_numbers<[1], [0], [0], [1], [0, 0, 1, 1], [], []>} : vector<2x48xf32>, vector<48x6xf32>, vector<2x6xf32> -> vector<2x6xf32>
    %c294 = arith.constant 294 : index
    %c0_30 = arith.constant 0 : index
    %49 = vector.load %arg3[%c294, %c0_30] : memref<296x128xf32, #tpu.memory_space<vmem>>, vector<1x6xf32>
    %50 = vector.broadcast %49 : vector<1x6xf32> to vector<2x6xf32>
    %51 = arith.addf %48, %50 : vector<2x6xf32>
    %52 = arith.subf %5, %46 : vector<2x6xf32>
    %53 = arith.mulf %52, %52 : vector<2x6xf32>
    %cst_31 = arith.constant 0.000000e+00 : f32
    %54 = vector.broadcast %cst_31 : f32 to vector<2x6xf32>
    %55 = arith.subf %54, %51 : vector<2x6xf32>
    %56 = math.exp %55 : vector<2x6xf32>
    %57 = arith.mulf %53, %56 : vector<2x6xf32>
    %58 = arith.addf %57, %51 : vector<2x6xf32>
    %cst_32 = arith.constant 1.83787704 : f32
    %59 = vector.broadcast %cst_32 : f32 to vector<2x6xf32>
    %60 = arith.addf %58, %59 : vector<2x6xf32>
    %cst_33 = arith.constant -5.000000e-01 : f32
    %61 = vector.broadcast %cst_33 : f32 to vector<2x6xf32>
    %62 = arith.mulf %61, %60 : vector<2x6xf32>
    %63 = vector.shape_cast %62 : vector<2x6xf32> to vector<1x2x6xf32>
    %cst_34 = arith.constant dense<0.000000e+00> : vector<1xf32>
    %64 = vector.multi_reduction <add>, %63, %cst_34 [1, 2] : vector<1x2x6xf32> to vector<1xf32>
    %65 = vector.shape_cast %64 : vector<1xf32> to vector<1x1x1xf32>
    %66 = vector.extract %65[0, 0, 0] : f32 from vector<1x1x1xf32>
    %67 = arith.mulf %66, %1 : f32
    %68 = arith.mulf %24, %24 : vector<2x12xf32>
    %69 = math.exp %29 : vector<2x12xf32>
    %70 = arith.addf %68, %69 : vector<2x12xf32>
    %cst_35 = arith.constant 1.000000e+00 : f32
    %71 = vector.broadcast %cst_35 : f32 to vector<2x12xf32>
    %72 = arith.subf %70, %71 : vector<2x12xf32>
    %73 = arith.subf %72, %29 : vector<2x12xf32>
    %cst_36 = arith.constant 5.000000e-01 : f32
    %74 = vector.broadcast %cst_36 : f32 to vector<2x12xf32>
    %75 = arith.mulf %74, %73 : vector<2x12xf32>
    %76 = vector.shape_cast %75 : vector<2x12xf32> to vector<1x2x12xf32>
    %cst_37 = arith.constant dense<0.000000e+00> : vector<1xf32>
    %77 = vector.multi_reduction <add>, %76, %cst_37 [1, 2] : vector<1x2x12xf32> to vector<1xf32>
    %78 = vector.shape_cast %77 : vector<1xf32> to vector<1x1x1xf32>
    %79 = vector.extract %78[0, 0, 0] : f32 from vector<1x1x1xf32>
    %80 = arith.mulf %79, %1 : f32
    %81 = arith.mulf %0, %80 : f32
    %82 = arith.subf %67, %81 : f32
    %83 = tpu.iota {dimensions = array<i32: 1>} : vector<1x128xi32>
    %c0_i32 = arith.constant 0 : i32
    %84 = vector.broadcast %c0_i32 : i32 to vector<1x128xi32>
    %85 = arith.cmpi eq, %83, %84 : vector<1x128xi32>
    %cst_38 = arith.constant 0.000000e+00 : f32
    %86 = vector.broadcast %82 : f32 to vector<1x128xf32>
    %87 = vector.broadcast %cst_38 : f32 to vector<1x128xf32>
    %88 = arith.select %85, %86, %87 : vector<1x128xi1>, vector<1x128xf32>
    %c1_i32 = arith.constant 1 : i32
    %89 = vector.broadcast %c1_i32 : i32 to vector<1x128xi32>
    %90 = arith.cmpi eq, %83, %89 : vector<1x128xi32>
    %91 = vector.broadcast %67 : f32 to vector<1x128xf32>
    %92 = arith.select %90, %91, %88 : vector<1x128xi1>, vector<1x128xf32>
    %c2_i32 = arith.constant 2 : i32
    %93 = vector.broadcast %c2_i32 : i32 to vector<1x128xi32>
    %94 = arith.cmpi eq, %83, %93 : vector<1x128xi32>
    %95 = vector.broadcast %80 : f32 to vector<1x128xf32>
    %96 = arith.select %94, %95, %92 : vector<1x128xi1>, vector<1x128xf32>
    %c0_39 = arith.constant 0 : index
    %c0_40 = arith.constant 0 : index
    %97 = vector.load %arg4[%c0_39, %c0_40] : memref<1x128xf32, #tpu.memory_space<vmem>>, vector<1x128xf32>
    tpu.vector_store %arg4[%c0_39, %c0_40], %96 {strides = array<i32>} : memref<1x128xf32, #tpu.memory_space<vmem>>, vector<1x128xf32>,
    return
  }
}

</mosaic_0001>

<bundles_post_ra>
// kernel: hvaca_forward_elbo_pallas.1
= control target key start
LH: loop header
LB: loop body
LE: loop exit
PB: predicated region body
PF: predicated region fallthrough
CT: control target
= control target key end

     0   :  { %9 = vsyncpa [#allocation4], 0  ;;  %s1163_s0 = inlined_call_operand.vmem [shape: f32[2], index: 0, kind: input, shape index: {}]   ;;  %s1164_s1 = inlined_call_operand.vmem [shape: f32[2,9], index: 1, kind: input, shape index: {}]   ;;  %s1165_s2 = inlined_call_operand.vmem [shape: f32[2,12], index: 2, kind: input, shape index: {}]   ;;  %s1166_s3 = inlined_call_operand.hbm [shape: f32[296,128], index: 3, kind: input, shape index: {}]   ;;  %s1167_s4 = inlined_call_operand.vmem [shape: f32[1,128], index: 4, kind: output, shape index: {}]  }
   0x1   :  { %s17_s17 = sshll.u32 %s1163_s0, 4  ;;  %s18_s17 = int_to_ptr.vmem [resolvable:$true] %s17_s17 }
   0x2   :  { %10 = vsyncpa [#allocation3], 0  ;;  %s1011_s18 = scalar_lea.vmem %s18_s17, 16  ;;  %p1016_p1 = scmp.lt.s32.totalorder %s18_s17, %s18_s17 }
   0x3   :  { %p1012_p0 = scmp.ne.s32.totalorder %s18_s17, %s1011_s18  ;;  %p1017_p2 = scmp.lt.s32.totalorder %s1011_s18, %s1011_s18 }
   0x5   :  { %p1018_p3 = por %p1017_p2, %p1016_p1 }
   0x7   :  { %p1019_p4 = pnand %p1018_p3, %p1012_p0 }
   0x9   :  { %1022 = shalt.err (!%p1019_p4)
}
   0xa   :  { %s1049_s19 = smov [#allocation2]   ;;  %s1050_s20 = smov [#allocation5]  }
   0xb   :  { %20 = dma.vmem_to_smem %s18_s17, 16, %s1049_s19, [#allocation4]  }
   0xc   :  { %s30_s21 = sshll.u32 %s1050_s20, 4  ;;  %s1023_s24 = scalar_lea.hbm %s1166_s3, 4736  ;;  %s31_s21 = int_to_ptr.vmem [resolvable:$true] %s30_s21 }
   0xd   :  { %p1024_p5 = scmp.ne.s32.totalorder %s1166_s3, %s1023_s24  ;;  %p1027_p6 = scmp.lt.u32.totalorder %s1023_s24, %s1166_s3 }
   0xf   :  { %p1029_p7 = pnand %p1027_p6, %p1024_p5 }
  0x11   :  { %1032 = shalt.err (!%p1029_p7)
}
  0x12   :  { %s1033_s28 = scalar_lea.vmem %s31_s21, 4736  ;;  %p1038_p9 = scmp.lt.s32.totalorder %s31_s21, %s31_s21 }
  0x13   :  { %p1034_p8 = scmp.ne.s32.totalorder %s31_s21, %s1033_s28  ;;  %p1039_p10 = scmp.lt.s32.totalorder %s1033_s28, %s1033_s28 }
  0x15   :  { %p1040_p11 = por %p1039_p10, %p1038_p9 }
  0x17   :  { %p1041_p12 = pnand %p1040_p11, %p1034_p8 }
  0x19   :  { %1044 = shalt.err (!%p1041_p12)
}
  0x1a   :  { %s1051_s29 = smov 128   ;;  %s1052_s30 = smov 8  }
  0x1b   :  { %36 = dma.hbm_to_vmem [thread:$0]  %s1166_s3, 4736, %s31_s21, [#allocation3], %s1051_s29, %s1051_s29, %s1052_s30  }
  0x1c   :  { %1045 = dma.done.wait [#allocation4], 16  }
  0x1d   :  { %1046 = vsyncadd [#allocation4], 4294967280 }
  0x1e   :  { %1047 = dma.done.wait [#allocation3], 4736  }
  0x1f   :  { %1048 = vsyncadd [#allocation3], 4294962560 }
  0x20   :  { %43 = sfence }
  0x21   :  { %v48_v0 = vld [vmem:[#allocation5] sm:$0xff]  ;;  %v49_v1 = vld [vmem:[#allocation5 + $0x8] sm:$0x1]  ;;  %vm54_vm0 = vcmask 1040384   ;;  %v1053_v2 = vmov 0.0|0.0   ;;  %vm1054_vm1 = vmmov 1  }
  0x22   :  { %936 = vmatprep.subr.bf16.mxu1 %v1053_v2  ;;  %v937_v3 = vpack.c.bf16 %v49_v1, %v48_v0  ;;  %vm1099_vm2 = vmpackc.low %vm54_vm0, %vm1054_vm1  ;;  %v128_v5 = vld [vmem:[#allocation5 + $0x10] sm:$0xff]  ;;  %944 = vmatprep.subr.bf16.mxu0 %v1053_v2  ;;  %vm1055_vm3 = vmmov 0   ;;  %v1056_v6 = vmov 0.0   ;;  %v129_v7 = vld [vmem:[#allocation5 + $0x18] sm:$0x1]  ;;  %vm50_vm4 = vcmask 72704  }
  0x23   :  { %844 = vmatprep.mubr.msk.f32.mxu1 %vm1055_vm3, %v1056_v6  ;;  %v209_v8 = vld [vmem:[#allocation5 + $0x20] sm:$0xff]  ;;  %866 = vmatprep.mubr.msk.f32.mxu0 %vm1055_vm3, %v1056_v6  ;;  %v941_v10 = vpack.c.bf16 %v129_v7, %v128_v5  ;;  %v210_v11 = vld [vmem:[#allocation5 + $0x28] sm:$0xff]  ;;  %v211_v13 = vld [vmem:[#allocation5 + $0x30] sm:$0xff]  ;;  %vm220_vm5 = vcmask 392192   ;;  %vm476_vm6 = vcmask 1043456   ;;  %vm472_vm8 = vcmask 97280  }
  0x24   :  { %939 = vmatpush3.bf16.msk.msra.mxu1 %vm1099_vm2, %v937_v3  ;;  %v46_v9 = vld [vmem:[%s1164_s1] sm:$0x3]  ;;  %v945_v12 = vpack.c.bf16 %v210_v11, %v209_v8  ;;  %v212_v14 = vld [vmem:[#allocation5 + $0x38] sm:$0xff]  ;;  %v214_v17 = vld [vmem:[#allocation5 + $0x48] sm:$0xff]  ;;  %vm725_vm9 = vcmask 41984   ;;  %vm744_vm10 = vcmask 91136  }
  0x25   :  { %940 = vmatprep.subr.bf16.mxu1 %v1053_v2  ;;  %v948_v15 = vpack.c.bf16 %v212_v14, %v211_v13  ;;  %v213_v16 = vld [vmem:[#allocation5 + $0x40] sm:$0xff]  ;;  %v295_v19 = vld [vmem:[#allocation5 + $0x50] sm:$0xff]  ;;  %v296_v20 = vld [vmem:[#allocation5 + $0x58] sm:$0xff]  ;;  %s44_s9 = sld [smem:[#allocation2]] }
  0x26   :  { %946 = vmatpush3.bf16.msra.mxu0 %v945_v12  ;;  %v951_v18 = vpack.c.bf16 %v214_v17, %v213_v16  ;;  %v954_v21 = vpack.c.bf16 %v296_v20, %v295_v19  ;;  %v297_v22 = vld [vmem:[#allocation5 + $0x60] sm:$0xff]  ;;  %v298_v23 = vld [vmem:[#allocation5 + $0x68] sm:$0xff]  ;;  %v381_v35 = vld [vmem:[#allocation5 + $0x90] sm:$0xff] }
  0x27   :  { %845 = vmatmul.mubr.msk.f32.vlgmr.msra.gmra.mrb[0].mxu1 %vm50_vm4, %v46_v9  ;;  %947 = vmatprep.subr.bf16.mxu0 %v1053_v2  ;;  %v957_v24 = vpack.c.bf16 %v298_v23, %v297_v22  ;;  %v779_v27 = vld [vmem:[#allocation5 + $0x120] ss:$0 sm:$0xff]  ;;  %v380_v29 = vld [vmem:[#allocation5 + $0x88] sm:$0xff]  ;;  %v382_v36 = vld [vmem:[#allocation5 + $0x98] sm:$0xff] }
  0x28   :  { %943 = vmatpush3.bf16.msk.msra.mxu1 %vm1099_vm2, %v941_v10  ;;  %851 = vmatprep.mubr.msk.f32.mxu1 %vm1055_vm3, %v1056_v6  ;;  %v379_v28 = vld [vmem:[#allocation5 + $0x80] sm:$0xff]  ;;  %v966_v37 = vpack.c.bf16 %v382_v36, %v381_v35  ;;  %v299_v38 = vld [vmem:[#allocation5 + $0x70] sm:$0xff]  ;;  %v300_v39 = vld [vmem:[#allocation5 + $0x78] sm:$0xff] }
  0x29   :  { %953 = vmatprep.subr.bf16.mxu1 %v1053_v2  ;;  %v963_v33 = vpack.c.bf16 %v380_v29, %v379_v28  ;;  %v383_v40 = vld [vmem:[#allocation5 + $0xa0] sm:$0xff]  ;;  %v960_v41 = vpack.c.bf16 %v300_v39, %v299_v38  ;;  %v384_v42 = vld [vmem:[#allocation5 + $0xa8] sm:$0xff]  ;;  %vm973_vm7 = vmpackc.low %vm476_vm6, %vm1054_vm1 }
  0x2a   :  { %949 = vmatpush3.bf16.msra.mxu0 %v948_v15  ;;  %v969_v43 = vpack.c.bf16 %v384_v42, %v383_v40  ;;  %v782_v44 = vld [vmem:[#allocation5 + $0x121] ss:$0 sm:$0xff]  ;;  %v465_v49 = vld [vmem:[#allocation5 + $0xb0] sm:$0xff]  ;;  %v466_v50 = vld [vmem:[#allocation5 + $0xb8] sm:$0xf] }
  0x2b   :  { %852 = vmatmul.mubr.msk.f32.vlgmr.msra.gmra.mrb[2].mxu1 %vm50_vm4, %v46_v9  ;;  %950 = vmatprep.subr.bf16.mxu0 %v1053_v2  ;;  %v972_v51 = vpack.c.bf16 %v466_v50, %v465_v49  ;;  %v635_v52 = vld [vmem:[#allocation5 + $0xf0] sm:$0xff]  ;;  %v636_v53 = vld [vmem:[#allocation5 + $0xf8] sm:$0xff]  ;;  %v637_v55 = vld [vmem:[#allocation5 + $0x100] sm:$0xff] }
  0x2c   :  { %881 = vmatprep.mubr.msk.f32.mxu1 %vm1055_vm3, %v1056_v6  ;;  %955 = vmatpush3.bf16.msra.mxu1 %v954_v21  ;;  %v985_v54 = vpack.c.bf16 %v636_v53, %v635_v52  ;;  %v638_v56 = vld [vmem:[#allocation5 + $0x108] sm:$0xff]  ;;  %v786_v58 = vld [vmem:[#allocation5 + $0x123] ss:$0 sm:$0xff]  ;;  %v784_v4 = vld [vmem:[#allocation5 + $0x122] ss:$0 sm:$0xff] }
  0x2d   :  { %956 = vmatprep.subr.bf16.mxu1 %v1053_v2  ;;  %v988_v57 = vpack.c.bf16 %v638_v56, %v637_v55  ;;  %v47_v9 = vld [vmem:[%s1165_s2] sm:$0x3]  ;;  %v552_v11 = vld [vmem:[#allocation5 + $0xc8] sm:$0xff]  ;;  %v554_v19 = vld [vmem:[#allocation5 + $0xd8] sm:$0xff]  ;;  %s776_s2 = sld [smem:[#allocation2 + $0x1]] }
  0x2e   :  { %952 = vmatpush3.bf16.msra.mxu0 %v951_v18  ;;  %v551_v10 = vld [vmem:[#allocation5 + $0xc0] sm:$0xff]  ;;  %v553_v18 = vld [vmem:[#allocation5 + $0xd0] sm:$0xff]  ;;  %v556_v23 = vld [vmem:[#allocation5 + $0xe8] sm:$0xff] }
  0x2f   :  { %962 = vmatprep.subr.bf16.mxu0 %v1053_v2  ;;  %v976_v16 = vpack.c.bf16 %v552_v11, %v551_v10  ;;  %v979_v21 = vpack.c.bf16 %v554_v19, %v553_v18  ;;  %v555_v22 = vld [vmem:[#allocation5 + $0xe0] sm:$0xff] }
  0x30   :  { %958 = vmatpush3.bf16.msra.mxu1 %v957_v24  ;;  %v639_v24 = vld [vmem:[#allocation5 + $0x110] sm:$0xff]  ;;  %v788_v29 = vld [vmem:[#allocation5 + $0x124] ss:$0 sm:$0xff] }
  0x31   :  { %959 = vmatprep.subr.bf16.mxu1 %v1053_v2 }
  0x34   :  { %961 = vmatpush3.bf16.msra.mxu1 %v960_v41 }
  0x35   :  { %971 = vmatprep.subr.bf16.mxu1 %v1053_v2 }
  0xfa   :  { %v1126_v25 = vpop.f32.mrb[0].mxu1 }
  0xfb   :  { %v846_v26 = vpop.f32.mrb[1].mxu1 }
  0xfc   :  { %v982_v26 = vpack.c.bf16 %v556_v23, %v555_v22 }
  0xfe   :  { %v204_v30 = vpop.f32.mrb[2].mxu1 }
  0xff   :  { %v205_v31 = vadd.f32 %v779_v27, %v204_v30  ;;  %v853_v32 = vpop.f32.mrb[3].mxu1  ;;  %v640_v27 = vld [vmem:[#allocation5 + $0x118] sm:$0xff] }
 0x100   :  { %v991_v28 = vpack.c.bf16 %v640_v27, %v639_v24 }
 0x101   :  { %v208_v34 = vmax.f32 %v205_v31, 0.0 }
 0x103   :  { %867 = vmatmul.mubr.msk.f32.vlgmr.msra.gmra.mrb[0].mxu0 %vm220_vm5, %v208_v34  ;;  %v793_v34 = vld [vmem:[#allocation5 + $0x126] ss:$0 sm:$0xff] }
 0x104   :  { %964 = vmatpush3.bf16.msra.mxu0 %v963_v33  ;;  %896 = vmatprep.mubr.msk.f32.mxu0 %vm1055_vm3, %v1056_v6 }
 0x105   :  { %965 = vmatprep.subr.bf16.mxu0 %v1053_v2 }
 0x108   :  { %967 = vmatpush3.bf16.msra.mxu0 %v966_v37 }
 0x109   :  { %968 = vmatprep.subr.bf16.mxu0 %v1053_v2 }
 0x10c   :  { %970 = vmatpush3.bf16.msra.mxu0 %v969_v43 }
 0x10d   :  { %984 = vmatprep.subr.bf16.mxu0 %v1053_v2 }
 0x1d6   :  { %v290_v45 = vpop.f32.mrb[0].mxu0 }
 0x1d7   :  { %v291_v46 = vadd.f32 %v782_v44, %v290_v45  ;;  %v868_v47 = vpop.f32.mrb[1].mxu0 }
 0x1d9   :  { %v294_v48 = vmax.f32 %v291_v46, 0.0 }
 0x1db   :  { %882 = vmatmul.mubr.msk.f32.vlgmr.msra.gmra.mrb[4].mxu1 %vm220_vm5, %v294_v48  ;;  %897 = vmatmul.mubr.msk.f32.vlgmr.msra.gmra.mrb[2].mxu0 %vm220_vm5, %v294_v48 }
 0x1dc   :  { %903 = vmatprep.mubr.msk.f32.mxu1 %vm1055_vm3, %v1056_v6  ;;  %933 = vmatprep.mubr.msk.f32.mxu0 %vm1055_vm3, %v1056_v6 }
 0x1dd   :  { %974 = vmatpush3.bf16.msk.msra.mxu1 %vm973_vm7, %v972_v51  ;;  %986 = vmatpush3.bf16.msra.mxu0 %v985_v54 }
 0x1de   :  { %975 = vmatprep.subr.bf16.mxu1 %v1053_v2  ;;  %987 = vmatprep.subr.bf16.mxu0 %v1053_v2 }
 0x1e1   :  { %989 = vmatpush3.bf16.msra.mxu0 %v988_v57 }
 0x1e2   :  { %990 = vmatprep.subr.bf16.mxu0 %v1053_v2 }
 0x1e5   :  { %992 = vmatpush3.bf16.msra.mxu0 %v991_v28 }
 0x2ae   :  { %v375_v59 = vpop.f32.mrb[4].mxu1  ;;  %v456_v60 = vpop.f32.mrb[2].mxu0 }
 0x2af   :  { %v1145_v61 = vadd.f32 %v786_v58, %v456_v60  ;;  %v883_v62 = vpop.f32.mrb[5].mxu1  ;;  %v898_v63 = vpop.f32.mrb[3].mxu0  ;;  %v376_v5 = vadd.f32 %v784_v4, %v375_v59 }
 0x2b1   :  { %v460_v0 = vmul.f32 0.5, %v1145_v61  ;;  %v738_v1 = vmul.f32 1.442695, %v1145_v61  ;;  %v737_v7 = vmul.f32 %v376_v5, %v376_v5 }
 0x2b3   :  { %v461_v3 = vmul.f32 1.442695, %v460_v0  ;;  %1005 = vpow2.f32 %v738_v1  ;;  %v758_v1 = vlaneseq }
 0x2b5   :  { %1007 = vpow2.f32 %v461_v3  ;;  %v759_v3 = vand.u32 127, %v758_v1 }
 0x2b7   :  { %vm760_vm11 = vcmp.eq.s32.totalorder %v759_v3, 0  ;;  %vm763_vm12 = vcmp.eq.s32.totalorder %v759_v3, 1  ;;  %vm766_vm13 = vcmp.eq.s32.totalorder %v759_v3, 2 }
 0x2bd   :  { %v1006_v8 = vpop.eup %1005 }
 0x2be   :  { %v740_v12 = vadd.f32 %v1006_v8, %v737_v7 }
 0x2bf   :  { %v1008_v13 = vpop.eup %1007 }
 0x2c0   :  { %v463_v14 = vmul.f32 %v1008_v13, %v47_v9  ;;  %v795_v15 = vadd.f32 -1.0, %v740_v12 }
 0x2c2   :  { %v464_v17 = vadd.f32 %v463_v14, %v376_v5  ;;  %v742_v20 = vsub.f32 %v795_v15, %v1145_v61 }
 0x2c4   :  { %904 = vmatmul.mubr.msk.f32.vlgmr.msra.gmra.mrb[6].mxu1 %vm472_vm8, %v464_v17  ;;  %v743_v50 = vmul.f32 0.5, %v742_v20 }
 0x2c5   :  { %977 = vmatpush3.bf16.msra.mxu1 %v976_v16  ;;  %918 = vmatprep.mubr.msk.f32.mxu1 %vm1055_vm3, %v1056_v6  ;;  %v791_v6 = vld [vmem:[#allocation5 + $0x125] ss:$0 sm:$0xff] }
 0x2c6   :  { %978 = vmatprep.subr.bf16.mxu1 %v1053_v2  ;;  %v745_v51 = vsel %vm744_vm10, %v743_v50, 0.0 }
 0x2c9   :  { %980 = vmatpush3.bf16.msra.mxu1 %v979_v21 }
 0x2ca   :  { %981 = vmatprep.subr.bf16.mxu1 %v1053_v2 }
 0x2cd   :  { %983 = vmatpush3.bf16.msra.mxu1 %v982_v26 }
 0x397   :  { %v546_v30 = vpop.f32.mrb[6].mxu1 }
 0x398   :  { %v547_v31 = vadd.f32 %v788_v29, %v546_v30  ;;  %v905_v32 = vpop.f32.mrb[7].mxu1 }
 0x39a   :  { %v550_v33 = vmax.f32 %v547_v31, 0.0 }
 0x39c   :  { %919 = vmatmul.mubr.msk.f32.vlgmr.msra.gmra.mrb[8].mxu1 %vm220_vm5, %v550_v33  ;;  %934 = vmatmul.mubr.msk.f32.vlgmr.msra.gmra.mrb[4].mxu0 %vm220_vm5, %v550_v33 }
 0x46f   :  { %v631_v2 = vpop.f32.mrb[8].mxu1  ;;  %v712_v35 = vpop.f32.mrb[4].mxu0 }
 0x470   :  { %v632_v36 = vadd.f32 %v791_v6, %v631_v2  ;;  %v713_v37 = vadd.f32 %v793_v34, %v712_v35  ;;  %v920_v38 = vpop.f32.mrb[9].mxu1  ;;  %v935_v39 = vpop.f32.mrb[5].mxu0 }
 0x472   :  { %v716_v40 = vsub.f32 %v1126_v25, %v632_v36  ;;  %v718_v41 = vsub.f32 0.0, %v713_v37 }
 0x474   :  { %v719_v42 = vmul.f32 1.442695, %v718_v41  ;;  %v717_v43 = vmul.f32 %v716_v40, %v716_v40 }
 0x476   :  { %1009 = vpow2.f32 %v719_v42 }
 0x480   :  { %v1010_v44 = vpop.eup %1009 }
 0x481   :  { %v721_v45 = vmul.f32 %v1010_v44, %v717_v43 }
 0x483   :  { %v722_v46 = vadd.f32 %v721_v45, %v713_v37 }
 0x485   :  { %v723_v47 = vadd.f32 1.837877, %v722_v46 }
 0x487   :  { %v724_v48 = vmul.f32 -0.5, %v723_v47 }
 0x489   :  { %v726_v49 = vsel %vm725_vm9, %v724_v48, 0.0 }
 0x48a   :  { %727 = vadd.xlane.f32.xlu0 %v726_v49 }
 0x48e   :  { %746 = vadd.xlane.f32.xlu0 %v745_v51 }
 0x517   :  { %v728_v52 = vpop.xlane.xlu0 %727 }
 0x518   :  { %v729_v53 = vrot.slane %v728_v52, 4 }
 0x51a   :  { %v730_v54 = vadd.f32 %v729_v53, %v728_v52 }
 0x51b   :  { %v747_v25 = vpop.xlane.xlu0 %746 }
 0x51c   :  { %v731_v55 = vrot.slane %v730_v54, 2  ;;  %v748_v56 = vrot.slane %v747_v25, 4 }
 0x51e   :  { %v749_v57 = vadd.f32 %v748_v56, %v747_v25  ;;  %v732_v58 = vadd.f32 %v731_v55, %v730_v54 }
 0x520   :  { %v750_v59 = vrot.slane %v749_v57, 2  ;;  %v733_v60 = vrot.slane %v732_v58, 1 }
 0x522   :  { %v751_v61 = vadd.f32 %v750_v59, %v749_v57  ;;  %v734_v62 = vadd.f32 %v733_v60, %v732_v58 }
 0x524   :  { %993 = vpush %v734_v62  ;;  %v752_v63 = vrot.slane %v751_v61, 1 }
 0x526   :  { %v753_v0 = vadd.f32 %v752_v63, %v751_v61 }
 0x528   :  { %995 = vpush %v753_v0 }
 0x555   :  { %s994_s10 = spop %993 }
 0x556   :  { %s736_s13 = smul.f32 %s994_s10, %s776_s2 }
 0x558   :  { %v764_v5 = vstv %s736_s13 }
 0x559   :  { %s996_s11 = spop %995 }
 0x55a   :  { %s755_s12 = smul.f32 %s996_s11, %s776_s2 }
 0x55c   :  { %s756_s14 = smul.f32 %s755_s12, %s44_s9  ;;  %v767_v9 = vstv %s755_s12 }
 0x55e   :  { %s757_s15 = ssub.f32 %s736_s13, %s756_s14 }
 0x560   :  { %v761_v4 = vstv %s757_s15 }
 0x561   :  { %v762_v7 = vsel %vm760_vm11, %v761_v4, 0.0 }
 0x562   :  { %v765_v8 = vsel %vm763_vm12, %v764_v5, %v762_v7 }
 0x563   :  { %v768_v10 = vsel %vm766_vm13, %v767_v9, %v765_v8 }
 0x564   :  { %769 = vst [vmem:[%s1167_s4] sm:$0x1] %v768_v10 }
 0x565   :  { %774 = vsyncpa [#allocation3], 1 }
 0x566   :  { %775 = vsyncpa [#allocation4], 1 }

</bundles_post_ra>
